<compile_context>
chip_gen: v5e
topology: v5e:2x2
jax: 0.10.0
libtpu: 0.0.40
codegen_flags: <defaults>
</compile_context>

<pallas_src>
import functools

import numpy as np

import jax
import jax.numpy as jnp
from jax.experimental import pallas as pl
from jax.experimental.pallas import tpu as pltpu


# ---------------------------------------------------------------------------
# align_corners=True bilinear interpolation matrix (out_size x in_size),
# identical to torch.nn.functional.interpolate(mode='bilinear',
# align_corners=True) applied separably along one axis.  Computed with numpy
# at trace time so it is a compile-time constant.
# ---------------------------------------------------------------------------
@functools.lru_cache(maxsize=None)
def interp_matrix_np(out_size: int, in_size: int) -> np.ndarray:
    if in_size == 1:
        return np.ones((out_size, 1), np.float32)
    if out_size == 1:
        # TODO(synk): size-1 output under align_corners=True is an edge case
        # (torch samples index 0); unused in the test below.
        m = np.zeros((1, in_size), np.float32)
        m[0, 0] = 1.0
        return m
    src = np.arange(out_size, dtype=np.float64) * (in_size - 1) / (out_size - 1)
    lo = np.clip(np.floor(src).astype(np.int64), 0, in_size - 2)
    hi = lo + 1
    w_hi = (src - lo).astype(np.float32)
    w_lo = (1.0 - w_hi).astype(np.float32)
    m = np.zeros((out_size, in_size), np.float32)
    rows = np.arange(out_size)
    m[rows, lo] += w_lo
    m[rows, hi] += w_hi
    return m


# ---------------------------------------------------------------------------
# Fused kernel.  refs = (x_0, MwT_0, Mh_0, ..., x_{L-1}, MwT_{L-1}, Mh_{L-1},
#                        out_ref, acc_ref)
#   x_l   : (B*H_l, W_l) f32    layer log-likelihoods
#   MwT_l : (W_l, oW)    f32    width-direction bilinear weights (transposed)
#   Mh_l  : (oH, H_l)    f32    height-direction bilinear weights
#   out   : (B*oH, oW)   f32    anomaly map (max(score) - score)
#   acc   : (B*oH, oW)   f32    VMEM scratch accumulator (written to HBM once)
# ---------------------------------------------------------------------------
def _fused_anomaly_kernel(*refs, num_layers, batch, heights, out_h):
    out_ref = refs[3 * num_layers]
    acc_ref = refs[3 * num_layers + 1]

    acc_ref[...] = jnp.zeros_like(acc_ref)

    for l in range(num_layers):
        x_ref, mwT_ref, mh_ref = refs[3 * l], refs[3 * l + 1], refs[3 * l + 2]
        h = heights[l]

        x = x_ref[...]                                   # (B*H, W) f32
        # Global max over the whole layer tensor (matches torch `.max()`,
        # intentionally coupled across the batch as in the reference module).
        gmax = jnp.max(x, keepdims=True)                 # (1, 1)
        p = jnp.exp(x - gmax)                            # (B*H, W), values in (0, 1]

        # Separable bilinear upsample:
        #   width  direction: (B*H, W) @ (W, oW) -> (B*H, oW)
        #   height direction: (oH, H) @ (H, oW)  -> (oH, oW), per batch image
        t = jnp.dot(p, mwT_ref[...], preferred_element_type=jnp.float32)
        mh = mh_ref[...]                                 # (oH, H) f32
        for b in range(batch):                           # static unroll, B tiny
            t_b = t[b * h:(b + 1) * h, :]                # (H, oW)
            acc_ref[b * out_h:(b + 1) * out_h, :] += jnp.dot(
                mh, t_b, preferred_element_type=jnp.float32)

    acc = acc_ref[...]
    smax = jnp.max(acc, keepdims=True)                   # global max of score map
    out_ref[...] = smax - acc


def _fused_anomaly_call(xs, mwTs, mhs, batch, heights, out_h, out_w):
    operands = []
    in_specs = []
    for x, mwT, mh in zip(xs, mwTs, mhs):
        for a in (x, mwT, mh):
            operands.append(a)
            # Whole (tiny) array as a single VMEM block.
            in_specs.append(pl.BlockSpec(a.shape, lambda i: (0, 0)))

    kernel = functools.partial(
        _fused_anomaly_kernel,
        num_layers=len(xs), batch=batch, heights=tuple(heights), out_h=out_h)

    return pl.pallas_call(
        kernel,
        out_shape=jax.ShapeDtypeStruct((batch * out_h, out_w), jnp.float32),
        grid=(1,),
        in_specs=in_specs,
        out_specs=pl.BlockSpec((batch * out_h, out_w), lambda i: (0, 0)),
        scratch_shapes=[pltpu.VMEM((batch * out_h, out_w), jnp.float32)],
        compiler_params=pltpu.CompilerParams(
            dimension_semantics=("arbitrary",),
            vmem_limit_bytes=32 * 1024 * 1024),
    )(*operands)


# ---------------------------------------------------------------------------
# Module-equivalent wrapper (AnomalyMapGenerator.forward).
# ---------------------------------------------------------------------------
def anomaly_map_generator(distribution, heights, widths, image_size):
    """distribution: list of flat (B*H_l*W_l,) arrays, one per pool layer."""
    out_h, out_w = image_size
    xs, mwTs, mhs = [], [], []
    batch = None
    for d, h, w in zip(distribution, heights, widths):
        x = jnp.asarray(d, jnp.float32).reshape(-1, w)          # (B*H, W)
        b = x.shape[0] // h
        if batch is None:
            batch = b
        assert b == batch, "inconsistent batch across pool layers"
        xs.append(x)
        mwTs.append(jnp.asarray(interp_matrix_np(out_w, w).T))  # (W, oW)
        mhs.append(jnp.asarray(interp_matrix_np(out_h, h)))     # (oH, H)
    out2d = _fused_anomaly_call(xs, mwTs, mhs, batch, heights, out_h, out_w)
    return out2d.reshape(batch, out_h, out_w)                   # free reshape


# ---------------------------------------------------------------------------
# Exact numpy reference (float64) for the self-check.
# ---------------------------------------------------------------------------
def anomaly_map_reference_np(distribution, heights, widths, image_size):
    out_h, out_w = image_size
    score = None
    for d, h, w in zip(distribution, heights, widths):
        x = np.asarray(d, np.float64).reshape(-1, h, w)
        p = np.exp(x - x.max())
        mh = interp_matrix_np(out_h, h).astype(np.float64)
        mw = interp_matrix_np(out_w, w).astype(np.float64)
        up = np.einsum('oh,bhw,pw->bop', mh, p, mw)
        score = up if score is None else score + up
    return score.max() - score


if __name__ == "__main__":
    key = jax.random.PRNGKey(0)
    B = 2
    image_size = (32, 32)
    pool_layers = ["layer2", "layer3"]            # two pooling layers
    heights = [16, 8]
    widths = [16, 8]

    keys = jax.random.split(key, len(pool_layers))
    # distribution[i] is the flattened log-likelihood tensor of layer i.
    distribution = [
        jax.random.normal(keys[i], (B * heights[i] * widths[i],), dtype=jnp.float32)
        for i in range(len(pool_layers))
    ]

    out = anomaly_map_generator(distribution, heights, widths, image_size)
    out = jax.block_until_ready(out)

    assert out.shape == (B, *image_size) and out.dtype == jnp.float32

    ref = anomaly_map_reference_np(distribution, heights, widths, image_size)
    err = float(np.max(np.abs(np.asarray(out, np.float64) - ref)))
    # f32 operands + f32 accumulation (typically ~1e-5 error); the bound is
    # conservative only to tolerate bf16 MXU passes at DEFAULT matmul precision.
    assert err < 2e-2, err

    print("KERNEL_OK")
</pallas_src>

<mosaic_0001>
module attributes {stable_mosaic.version = 11 : i64} {
  func.func @_fused_anomaly_kernel(%arg0: i32, %arg1: memref<32x16xf32, #tpu.memory_space<vmem>>, %arg2: memref<16x32xf32, #tpu.memory_space<vmem>>, %arg3: memref<32x16xf32, #tpu.memory_space<vmem>>, %arg4: memref<16x8xf32, #tpu.memory_space<vmem>>, %arg5: memref<8x32xf32, #tpu.memory_space<vmem>>, %arg6: memref<32x8xf32, #tpu.memory_space<vmem>>, %arg7: memref<64x32xf32, #tpu.memory_space<vmem>>, %arg8: memref<64x32xf32, #tpu.memory_space<vmem>>) attributes {dimension_semantics = [#tpu.dimension_semantics<arbitrary>], iteration_bounds = array<i64: 1>, scalar_prefetch = 0 : i64, scratch_operands = 1 : i64, tpu.core_type = #tpu.core_type<tc>, window_params = [{pipeline_mode = #tpu.pipeline_mode<synchronous>, transform_indices = @transform_0, window_bounds = array<i64: 32, 16>}, {pipeline_mode = #tpu.pipeline_mode<synchronous>, transform_indices = @transform_1, window_bounds = array<i64: 16, 32>}, {pipeline_mode = #tpu.pipeline_mode<synchronous>, transform_indices = @transform_2, window_bounds = array<i64: 32, 16>}, {pipeline_mode = #tpu.pipeline_mode<synchronous>, transform_indices = @transform_3, window_bounds = array<i64: 16, 8>}, {pipeline_mode = #tpu.pipeline_mode<synchronous>, transform_indices = @transform_4, window_bounds = array<i64: 8, 32>}, {pipeline_mode = #tpu.pipeline_mode<synchronous>, transform_indices = @transform_5, window_bounds = array<i64: 32, 8>}, {pipeline_mode = #tpu.pipeline_mode<synchronous>, transform_indices = @transform_6, window_bounds = array<i64: 64, 32>}]} {
    %cst = arith.constant 0.000000e+00 : f32
    %0 = vector.broadcast %cst : f32 to vector<64x32xf32>
    %c0 = arith.constant 0 : index
    %c0_0 = arith.constant 0 : index
    %1 = vector.load %arg8[%c0, %c0_0] : memref<64x32xf32, #tpu.memory_space<vmem>>, vector<64x32xf32>
    tpu.vector_store %arg8[%c0, %c0_0], %0 {strides = array<i32>} : memref<64x32xf32, #tpu.memory_space<vmem>>, vector<64x32xf32>,
    %c0_1 = arith.constant 0 : index
    %c0_2 = arith.constant 0 : index
    %2 = vector.load %arg1[%c0_1, %c0_2] : memref<32x16xf32, #tpu.memory_space<vmem>>, vector<32x16xf32>
    %3 = vector.shape_cast %2 : vector<32x16xf32> to vector<1x32x16xf32>
    %cst_3 = arith.constant dense<0xFF800000> : vector<1xf32>
    %4 = vector.multi_reduction <maximumf>, %3, %cst_3 [1, 2] : vector<1x32x16xf32> to vector<1xf32>
    %5 = vector.shape_cast %4 : vector<1xf32> to vector<1x1x1xf32>
    %6 = vector.extract %5[0, 0, 0] : f32 from vector<1x1x1xf32>
    %7 = vector.broadcast %6 : f32 to vector<1x1xf32>
    %8 = vector.broadcast %7 : vector<1x1xf32> to vector<32x16xf32>
    %9 = arith.subf %2, %8 : vector<32x16xf32>
    %10 = math.exp %9 : vector<32x16xf32>
    %c0_4 = arith.constant 0 : index
    %c0_5 = arith.constant 0 : index
    %11 = vector.load %arg2[%c0_4, %c0_5] : memref<16x32xf32, #tpu.memory_space<vmem>>, vector<16x32xf32>
    %cst_6 = arith.constant dense<0.000000e+00> : vector<32x32xf32>
    %12 = tpu.matmul %10, %11, %cst_6 {dimension_numbers = #tpu.dot_dimension_numbers<[1], [0], [0], [1], [0, 0, 1, 1], [], []>} : vector<32x16xf32>, vector<16x32xf32>, vector<32x32xf32> -> vector<32x32xf32>
    %c0_7 = arith.constant 0 : index
    %c0_8 = arith.constant 0 : index
    %13 = vector.load %arg3[%c0_7, %c0_8] : memref<32x16xf32, #tpu.memory_space<vmem>>, vector<32x16xf32>
    %14 = vector.extract_strided_slice %12 {offsets = [0, 0], sizes = [16, 32], strides = [1, 1]} : vector<32x32xf32> to vector<16x32xf32>
    %c0_9 = arith.constant 0 : index
    %c0_10 = arith.constant 0 : index
    %15 = vector.load %arg8[%c0_9, %c0_10] : memref<64x32xf32, #tpu.memory_space<vmem>>, vector<32x32xf32>
    %cst_11 = arith.constant dense<0.000000e+00> : vector<32x32xf32>
    %16 = tpu.matmul %13, %14, %cst_11 {dimension_numbers = #tpu.dot_dimension_numbers<[1], [0], [0], [1], [0, 0, 1, 1], [], []>} : vector<32x16xf32>, vector<16x32xf32>, vector<32x32xf32> -> vector<32x32xf32>
    %17 = arith.addf %15, %16 : vector<32x32xf32>
    %c0_12 = arith.constant 0 : index
    %c0_13 = arith.constant 0 : index
    %18 = vector.load %arg8[%c0_12, %c0_13] : memref<64x32xf32, #tpu.memory_space<vmem>>, vector<32x32xf32>
    tpu.vector_store %arg8[%c0_12, %c0_13], %17 {strides = array<i32>} : memref<64x32xf32, #tpu.memory_space<vmem>>, vector<32x32xf32>,
    %19 = vector.extract_strided_slice %12 {offsets = [16, 0], sizes = [16, 32], strides = [1, 1]} : vector<32x32xf32> to vector<16x32xf32>
    %c32 = arith.constant 32 : index
    %c0_14 = arith.constant 0 : index
    %20 = vector.load %arg8[%c32, %c0_14] : memref<64x32xf32, #tpu.memory_space<vmem>>, vector<32x32xf32>
    %cst_15 = arith.constant dense<0.000000e+00> : vector<32x32xf32>
    %21 = tpu.matmul %13, %19, %cst_15 {dimension_numbers = #tpu.dot_dimension_numbers<[1], [0], [0], [1], [0, 0, 1, 1], [], []>} : vector<32x16xf32>, vector<16x32xf32>, vector<32x32xf32> -> vector<32x32xf32>
    %22 = arith.addf %20, %21 : vector<32x32xf32>
    %c32_16 = arith.constant 32 : index
    %c0_17 = arith.constant 0 : index
    %23 = vector.load %arg8[%c32_16, %c0_17] : memref<64x32xf32, #tpu.memory_space<vmem>>, vector<32x32xf32>
    tpu.vector_store %arg8[%c32_16, %c0_17], %22 {strides = array<i32>} : memref<64x32xf32, #tpu.memory_space<vmem>>, vector<32x32xf32>,
    %c0_18 = arith.constant 0 : index
    %c0_19 = arith.constant 0 : index
    %24 = vector.load %arg4[%c0_18, %c0_19] : memref<16x8xf32, #tpu.memory_space<vmem>>, vector<16x8xf32>
    %25 = vector.shape_cast %24 : vector<16x8xf32> to vector<1x16x8xf32>
    %cst_20 = arith.constant dense<0xFF800000> : vector<1xf32>
    %26 = vector.multi_reduction <maximumf>, %25, %cst_20 [1, 2] : vector<1x16x8xf32> to vector<1xf32>
    %27 = vector.shape_cast %26 : vector<1xf32> to vector<1x1x1xf32>
    %28 = vector.extract %27[0, 0, 0] : f32 from vector<1x1x1xf32>
    %29 = vector.broadcast %28 : f32 to vector<1x1xf32>
    %30 = vector.broadcast %29 : vector<1x1xf32> to vector<16x8xf32>
    %31 = arith.subf %24, %30 : vector<16x8xf32>
    %32 = math.exp %31 : vector<16x8xf32>
    %c0_21 = arith.constant 0 : index
    %c0_22 = arith.constant 0 : index
    %33 = vector.load %arg5[%c0_21, %c0_22] : memref<8x32xf32, #tpu.memory_space<vmem>>, vector<8x32xf32>
    %cst_23 = arith.constant dense<0.000000e+00> : vector<16x32xf32>
    %34 = tpu.matmul %32, %33, %cst_23 {dimension_numbers = #tpu.dot_dimension_numbers<[1], [0], [0], [1], [0, 0, 1, 1], [], []>} : vector<16x8xf32>, vector<8x32xf32>, vector<16x32xf32> -> vector<16x32xf32>
    %c0_24 = arith.constant 0 : index
    %c0_25 = arith.constant 0 : index
    %35 = vector.load %arg6[%c0_24, %c0_25] : memref<32x8xf32, #tpu.memory_space<vmem>>, vector<32x8xf32>
    %36 = vector.extract_strided_slice %34 {offsets = [0, 0], sizes = [8, 32], strides = [1, 1]} : vector<16x32xf32> to vector<8x32xf32>
    %c0_26 = arith.constant 0 : index
    %c0_27 = arith.constant 0 : index
    %37 = vector.load %arg8[%c0_26, %c0_27] : memref<64x32xf32, #tpu.memory_space<vmem>>, vector<32x32xf32>
    %cst_28 = arith.constant dense<0.000000e+00> : vector<32x32xf32>
    %38 = tpu.matmul %35, %36, %cst_28 {dimension_numbers = #tpu.dot_dimension_numbers<[1], [0], [0], [1], [0, 0, 1, 1], [], []>} : vector<32x8xf32>, vector<8x32xf32>, vector<32x32xf32> -> vector<32x32xf32>
    %39 = arith.addf %37, %38 : vector<32x32xf32>
    %c0_29 = arith.constant 0 : index
    %c0_30 = arith.constant 0 : index
    %40 = vector.load %arg8[%c0_29, %c0_30] : memref<64x32xf32, #tpu.memory_space<vmem>>, vector<32x32xf32>
    tpu.vector_store %arg8[%c0_29, %c0_30], %39 {strides = array<i32>} : memref<64x32xf32, #tpu.memory_space<vmem>>, vector<32x32xf32>,
    %41 = vector.extract_strided_slice %34 {offsets = [8, 0], sizes = [8, 32], strides = [1, 1]} : vector<16x32xf32> to vector<8x32xf32>
    %c32_31 = arith.constant 32 : index
    %c0_32 = arith.constant 0 : index
    %42 = vector.load %arg8[%c32_31, %c0_32] : memref<64x32xf32, #tpu.memory_space<vmem>>, vector<32x32xf32>
    %cst_33 = arith.constant dense<0.000000e+00> : vector<32x32xf32>
    %43 = tpu.matmul %35, %41, %cst_33 {dimension_numbers = #tpu.dot_dimension_numbers<[1], [0], [0], [1], [0, 0, 1, 1], [], []>} : vector<32x8xf32>, vector<8x32xf32>, vector<32x32xf32> -> vector<32x32xf32>
    %44 = arith.addf %42, %43 : vector<32x32xf32>
    %c32_34 = arith.constant 32 : index
    %c0_35 = arith.constant 0 : index
    %45 = vector.load %arg8[%c32_34, %c0_35] : memref<64x32xf32, #tpu.memory_space<vmem>>, vector<32x32xf32>
    tpu.vector_store %arg8[%c32_34, %c0_35], %44 {strides = array<i32>} : memref<64x32xf32, #tpu.memory_space<vmem>>, vector<32x32xf32>,
    %c0_36 = arith.constant 0 : index
    %c0_37 = arith.constant 0 : index
    %46 = vector.load %arg8[%c0_36, %c0_37] : memref<64x32xf32, #tpu.memory_space<vmem>>, vector<64x32xf32>
    %47 = vector.shape_cast %46 : vector<64x32xf32> to vector<1x64x32xf32>
    %cst_38 = arith.constant dense<0xFF800000> : vector<1xf32>
    %48 = vector.multi_reduction <maximumf>, %47, %cst_38 [1, 2] : vector<1x64x32xf32> to vector<1xf32>
    %49 = vector.shape_cast %48 : vector<1xf32> to vector<1x1x1xf32>
    %50 = vector.extract %49[0, 0, 0] : f32 from vector<1x1x1xf32>
    %51 = vector.broadcast %50 : f32 to vector<1x1xf32>
    %52 = vector.broadcast %51 : vector<1x1xf32> to vector<64x32xf32>
    %53 = arith.subf %52, %46 : vector<64x32xf32>
    %c0_39 = arith.constant 0 : index
    %c0_40 = arith.constant 0 : index
    %54 = vector.load %arg7[%c0_39, %c0_40] : memref<64x32xf32, #tpu.memory_space<vmem>>, vector<64x32xf32>
    tpu.vector_store %arg7[%c0_39, %c0_40], %53 {strides = array<i32>} : memref<64x32xf32, #tpu.memory_space<vmem>>, vector<64x32xf32>,
    return
  }
  func.func @transform_0(%arg0: i32) -> (i32, i32) {
    %c0_i32 = arith.constant 0 : i32
    %c0_i32_0 = arith.constant 0 : i32
    %c0_i32_1 = arith.constant 0 : i32
    return %c0_i32, %c0_i32_0 : i32, i32
  }
  func.func @transform_1(%arg0: i32) -> (i32, i32) {
    %c0_i32 = arith.constant 0 : i32
    %c0_i32_0 = arith.constant 0 : i32
    %c0_i32_1 = arith.constant 0 : i32
    return %c0_i32, %c0_i32_0 : i32, i32
  }
  func.func @transform_2(%arg0: i32) -> (i32, i32) {
    %c0_i32 = arith.constant 0 : i32
    %c0_i32_0 = arith.constant 0 : i32
    %c0_i32_1 = arith.constant 0 : i32
    return %c0_i32, %c0_i32_0 : i32, i32
  }
  func.func @transform_3(%arg0: i32) -> (i32, i32) {
    %c0_i32 = arith.constant 0 : i32
    %c0_i32_0 = arith.constant 0 : i32
    %c0_i32_1 = arith.constant 0 : i32
    return %c0_i32, %c0_i32_0 : i32, i32
  }
  func.func @transform_4(%arg0: i32) -> (i32, i32) {
    %c0_i32 = arith.constant 0 : i32
    %c0_i32_0 = arith.constant 0 : i32
    %c0_i32_1 = arith.constant 0 : i32
    return %c0_i32, %c0_i32_0 : i32, i32
  }
  func.func @transform_5(%arg0: i32) -> (i32, i32) {
    %c0_i32 = arith.constant 0 : i32
    %c0_i32_0 = arith.constant 0 : i32
    %c0_i32_1 = arith.constant 0 : i32
    return %c0_i32, %c0_i32_0 : i32, i32
  }
  func.func @transform_6(%arg0: i32) -> (i32, i32) {
    %c0_i32 = arith.constant 0 : i32
    %c0_i32_0 = arith.constant 0 : i32
    %c0_i32_1 = arith.constant 0 : i32
    return %c0_i32, %c0_i32_0 : i32, i32
  }
}

</mosaic_0001>

<bundles_post_ra>
// kernel: tpu_custom_call.1
= control target key start
LH: loop header
LB: loop body
LE: loop exit
PB: predicated region body
PF: predicated region fallthrough
CT: control target
= control target key end

     0   :  { %vm36_vm0 = vcmask 130048   ;;  %vm209_vm1 = vcmask 64512   ;;  %vm23_vm2 = vcmask 261120   ;;  %v455_v61 = vmov 0.0   ;;  %s634_s0 = inlined_call_operand.vmem [shape: f32[32,16], index: 0, kind: input, shape index: {}]   ;;  %s635_s3 = inlined_call_operand.vmem [shape: f32[16,8], index: 3, kind: input, shape index: {}]   ;;  %s636_s1 = inlined_call_operand.vmem [shape: f32[16,32], index: 1, kind: input, shape index: {}]   ;;  %s637_s4 = inlined_call_operand.vmem [shape: f32[8,32], index: 4, kind: input, shape index: {}]   ;;  %s638_s2 = inlined_call_operand.vmem [shape: f32[32,16], index: 2, kind: input, shape index: {}]   ;;  %s639_s5 = inlined_call_operand.vmem [shape: f32[32,8], index: 5, kind: input, shape index: {}]   ;;  %s640_s6 = inlined_call_operand.vmem [shape: f32[64,32], index: 6, kind: output, shape index: {}]  }
   0x1   :  { %v32_v0 = vld [vmem:[%s634_s0] sm:$0xff]  ;;  %v33_v1 = vld [vmem:[%s634_s0 + $0x8] sm:$0xff]  ;;  %v34_v2 = vld [vmem:[%s634_s0 + $0x10] sm:$0xff]  ;;  %24 = vst.msk [vmem:[#allocation2] sm:$0xff] %vm23_vm2, %v455_v61 }
   0x2   :  { %v35_v3 = vld [vmem:[%s634_s0 + $0x18] sm:$0xff]  ;;  %v37_v4 = vsel %vm36_vm0, %v32_v0, -inf  ;;  %v38_v5 = vsel %vm36_vm0, %v33_v1, -inf  ;;  %v39_v6 = vsel %vm36_vm0, %v34_v2, -inf  ;;  %v207_v11 = vld [vmem:[%s635_s3] sm:$0xff]  ;;  %v208_v12 = vld [vmem:[%s635_s3 + $0x8] sm:$0xff] }
   0x3   :  { %v40_v7 = vsel %vm36_vm0, %v35_v3, -inf  ;;  %v41_v8 = vmax.f32 %v37_v4, %v38_v5  ;;  %v210_v13 = vsel %vm209_vm1, %v207_v11, -inf  ;;  %v211_v14 = vsel %vm209_vm1, %v208_v12, -inf  ;;  %v67_v30 = vld [vmem:[%s636_s1 + $0x8] sm:$0xff]  ;;  %v66_v31 = vld [vmem:[%s636_s1] sm:$0xff]  ;;  %25 = vst.msk [vmem:[#allocation2 + $0x8] sm:$0xff] %vm23_vm2, %v455_v61 }
   0x4   :  { %v42_v9 = vmax.f32 %v39_v6, %v40_v7  ;;  %v212_v15 = vmax.f32 %v210_v13, %v211_v14  ;;  %94 = vmatpush.msra.mxu0 %v67_v30  ;;  %432 = vmatpush.msra.mxu1 %v67_v30  ;;  %v229_v32 = vld [vmem:[%s637_s4] sm:$0xff]  ;;  %v110_v58 = vld [vmem:[%s638_s2 + $0x8] sm:$0xff]  ;;  %26 = vst.msk [vmem:[#allocation2 + $0x10] sm:$0xff] %vm23_vm2, %v455_v61  ;;  %v111_v62 = vld [vmem:[%s638_s2 + $0x10] sm:$0xff] }
   0x5   :  { %433 = vmatpush.msra.mxu2 %v67_v30  ;;  %251 = vmatpush.msra.mxu3 %v229_v32  ;;  %v109_v55 = vld [vmem:[%s638_s2] sm:$0xff]  ;;  %27 = vst.msk [vmem:[#allocation2 + $0x18] sm:$0xff] %vm23_vm2, %v455_v61  ;;  %v260_v63 = vld [vmem:[%s639_s5 + $0x8] sm:$0xff] }
   0x6   :  { %v43_v10 = vmax.f32 %v41_v8, %v42_v9  ;;  %95 = vmatpush.msra.mxu0 %v66_v31  ;;  %434 = vmatpush.msra.mxu1 %v66_v31  ;;  %v259_v59 = vld [vmem:[%s639_s5] sm:$0xff]  ;;  %28 = vst.msk [vmem:[#allocation2 + $0x20] sm:$0xff] %vm23_vm2, %v455_v61 }
   0x7   :  { %435 = vmatpush.msra.mxu2 %v66_v31  ;;  %29 = vst.msk [vmem:[#allocation2 + $0x28] sm:$0xff] %vm23_vm2, %v455_v61 }
   0x8   :  { %44 = vmax.xlane.f32.xlu0 %v43_v10  ;;  %30 = vst.msk [vmem:[#allocation2 + $0x30] sm:$0xff] %vm23_vm2, %v455_v61  ;;  %v113_v4 = vld [vmem:[#allocation2] sm:$0xff] }
   0x9   :  { %31 = vst.msk [vmem:[#allocation2 + $0x38] sm:$0xff] %vm23_vm2, %v455_v61 }
   0xa   :  { %v114_v7 = vld [vmem:[#allocation2 + $0x8] sm:$0xff] }
   0xd   :  { %v166_v10 = vld [vmem:[#allocation2 + $0x20] sm:$0xff] }
   0xf   :  { %v168_v32 = vld [vmem:[#allocation2 + $0x30] sm:$0xff] }
  0x10   :  { %213 = vmax.xlane.f32.xlu0 %v212_v15 }
  0x7b   :  { %v45_v16 = vpop.xlane.xlu0 %44 }
  0x7c   :  { %v46_v17 = vrot.slane %v45_v16, 4 }
  0x7e   :  { %v47_v18 = vmax.f32 %v45_v16, %v46_v17 }
  0x80   :  { %v48_v19 = vrot.slane %v47_v18, 2 }
  0x82   :  { %v49_v20 = vmax.f32 %v47_v18, %v48_v19 }
  0x83   :  { %v214_v21 = vpop.xlane.xlu0 %213 }
  0x84   :  { %v215_v22 = vrot.slane %v214_v21, 4  ;;  %v50_v23 = vrot.slane %v49_v20, 1 }
  0x86   :  { %v216_v24 = vmax.f32 %v214_v21, %v215_v22  ;;  %v51_v25 = vmax.f32 %v49_v20, %v50_v23  ;;  %v167_v20 = vld [vmem:[#allocation2 + $0x28] sm:$0xff]  ;;  %v116_v22 = vld [vmem:[#allocation2 + $0x18] sm:$0xff] }
  0x88   :  { %v217_v26 = vrot.slane %v216_v24, 2  ;;  %436 = vpush %v51_v25 }
  0x8a   :  { %v218_v27 = vmax.f32 %v216_v24, %v217_v26 }
  0x8c   :  { %v219_v28 = vrot.slane %v218_v27, 1 }
  0x8e   :  { %v220_v29 = vmax.f32 %v218_v27, %v219_v28 }
  0x90   :  { %438 = vpush %v220_v29 }
  0xb9   :  { %s437_s13 = spop %436 }
  0xba   :  { %v53_v33 = vstv %s437_s13 }
  0xbb   :  { %v54_v34 = vsub.f32 %v32_v0, %v53_v33  ;;  %v55_v35 = vsub.f32 %v33_v1, %v53_v33  ;;  %v57_v36 = vsub.f32 %v35_v3, %v53_v33  ;;  %v56_v40 = vsub.f32 %v34_v2, %v53_v33  ;;  %v112_v1 = vld [vmem:[%s638_s2 + $0x18] sm:$0xff]  ;;  %v261_v2 = vld [vmem:[%s639_s5 + $0x10] sm:$0xff] }
  0xbc   :  { %v262_v3 = vld [vmem:[%s639_s5 + $0x18] sm:$0xff] }
  0xbd   :  { %v58_v37 = vmul.f32 1.442695, %v54_v34  ;;  %v60_v38 = vmul.f32 1.442695, %v55_v35  ;;  %v64_v39 = vmul.f32 1.442695, %v57_v36 }
  0xbe   :  { %v62_v43 = vmul.f32 1.442695, %v56_v40  ;;  %v169_v40 = vld [vmem:[#allocation2 + $0x38] sm:$0xff] }
  0xbf   :  { %443 = vpow2.f32 %v58_v37 }
  0xc0   :  { %445 = vpow2.f32 %v60_v38 }
  0xc1   :  { %s439_s1 = spop %438  ;;  %447 = vpow2.f32 %v64_v39 }
  0xc2   :  { %v222_v41 = vstv %s439_s1 }
  0xc3   :  { %v223_v42 = vsub.f32 %v207_v11, %v222_v41  ;;  %v224_v47 = vsub.f32 %v208_v12, %v222_v41  ;;  %v115_v12 = vld [vmem:[#allocation2 + $0x10] sm:$0xff] }
  0xc5   :  { %v444_v44 = vpop.eup %443  ;;  %v225_v45 = vmul.f32 1.442695, %v223_v42  ;;  %v227_v49 = vmul.f32 1.442695, %v224_v47 }
  0xc6   :  { %v446_v46 = vpop.eup %445  ;;  %410 = vmatmul.msk.f32.vlgmr.msra.gmra.mxu0 %vm36_vm0, %v444_v44 }
  0xc7   :  { %449 = vpow2.f32 %v225_v45  ;;  %411 = vmatmul.msk.f32.vlgmr.msra.gmra.mxu1 %vm36_vm0, %v446_v46  ;;  %v448_v48 = vpop.eup %447 }
  0xc8   :  { %451 = vpow2.f32 %v62_v43  ;;  %413 = vmatmul.msk.f32.vlgmr.msra.gmra.mxu2 %vm36_vm0, %v448_v48 }
  0xc9   :  { %453 = vpow2.f32 %v227_v49 }
  0xcd   :  { %v450_v50 = vpop.eup %449 }
  0xce   :  { %v452_v51 = vpop.eup %451  ;;  %422 = vmatmul.msk.f32.vlgmr.msra.gmra.mxu3 %vm209_vm1, %v450_v50 }
  0xcf   :  { %412 = vmatmul.msk.f32.gmra.mxu1 %vm36_vm0, %v452_v51  ;;  %v454_v52 = vpop.eup %453 }
  0xd6   :  { %423 = vmatmul.msk.f32.gmra.mxu3 %vm209_vm1, %v454_v52 }
 0x143   :  { %v97_v54 = vpop.f32.mrf.mxu0 }
 0x144   :  { %v100_v53 = vpop.f32.mrf.mxu1 }
 0x145   :  { %143 = vmatpush.msrb.mxu1 %v100_v53 }
 0x147   :  { %144 = vmatpush.msrb.mxu1 %v97_v54 }
 0x148   :  { %414 = vmatmul.msk.f32.vlgmr.msrb.gmra.mxu1 %vm36_vm0, %v109_v55 }
 0x14b   :  { %v106_v56 = vpop.f32.mrf.mxu2 }
 0x14c   :  { %v103_v57 = vpop.f32.mrf.mxu1  ;;  %184 = vmatpush.msrb.mxu2 %v106_v56 }
 0x14e   :  { %185 = vmatpush.msrb.mxu2 %v103_v57 }
 0x14f   :  { %418 = vmatmul.msk.f32.vlgmr.msrb.gmra.mxu2 %vm36_vm0, %v109_v55 }
 0x150   :  { %415 = vmatmul.msk.f32.gmra.mxu1 %vm36_vm0, %v110_v58 }
 0x151   :  { %v253_v60 = vpop.f32.mrf.mxu3 }
 0x152   :  { %294 = vmatpush.msrb.mxu3 %v253_v60 }
 0x153   :  { %424 = vmatmul.msk.f32.vlgmr.msrb.gmra.mxu3 %vm209_vm1, %v259_v59 }
 0x157   :  { %419 = vmatmul.msk.f32.gmra.mxu2 %vm36_vm0, %v110_v58 }
 0x158   :  { %416 = vmatmul.msk.f32.gmra.mxu1 %vm36_vm0, %v111_v62 }
 0x159   :  { %v256_v0 = vpop.f32.mrf.mxu3 }
 0x15a   :  { %335 = vmatpush.msrb.mxu0 %v256_v0 }
 0x15b   :  { %428 = vmatmul.msk.f32.vlgmr.msrb.gmra.mxu0 %vm209_vm1, %v259_v59  ;;  %425 = vmatmul.msk.f32.gmra.mxu3 %vm209_vm1, %v260_v63 }
 0x15f   :  { %420 = vmatmul.msk.f32.gmra.mxu2 %vm36_vm0, %v111_v62 }
 0x160   :  { %417 = vmatmul.msk.f32.gmra.mxu1 %vm36_vm0, %v112_v1 }
 0x163   :  { %429 = vmatmul.msk.f32.gmra.mxu0 %vm209_vm1, %v260_v63  ;;  %426 = vmatmul.msk.f32.gmra.mxu3 %vm209_vm1, %v261_v2 }
 0x167   :  { %421 = vmatmul.msk.f32.gmra.mxu2 %vm36_vm0, %v112_v1 }
 0x16b   :  { %430 = vmatmul.msk.f32.gmra.mxu0 %vm209_vm1, %v261_v2  ;;  %427 = vmatmul.msk.f32.gmra.mxu3 %vm209_vm1, %v262_v3 }
 0x173   :  { %431 = vmatmul.msk.f32.gmra.mxu0 %vm209_vm1, %v262_v3 }
 0x1c5   :  { %v146_v5 = vpop.f32.mrf.mxu1 }
 0x1c6   :  { %v158_v6 = vadd.f32 %v146_v5, %v113_v4 }
 0x1c8   :  { %162 = vst.msk [vmem:[#allocation2] sm:$0xff] %vm23_vm2, %v158_v6 }
 0x1cd   :  { %v149_v8 = vpop.f32.mrf.mxu1 }
 0x1ce   :  { %v159_v9 = vadd.f32 %v149_v8, %v114_v7 }
 0x1cf   :  { %v263_v14 = vld [vmem:[#allocation2] sm:$0xff] }
 0x1d0   :  { %163 = vst.msk [vmem:[#allocation2 + $0x8] sm:$0xff] %vm23_vm2, %v159_v9 }
 0x1d2   :  { %v187_v11 = vpop.f32.mrf.mxu2 }
 0x1d3   :  { %v199_v13 = vadd.f32 %v187_v11, %v166_v10 }
 0x1d5   :  { %v152_v15 = vpop.f32.mrf.mxu1  ;;  %203 = vst.msk [vmem:[#allocation2 + $0x20] sm:$0xff] %vm23_vm2, %v199_v13 }
 0x1d6   :  { %v296_v16 = vpop.f32.mrf.mxu3  ;;  %v160_v17 = vadd.f32 %v152_v15, %v115_v12 }
 0x1d7   :  { %v308_v18 = vadd.f32 %v296_v16, %v263_v14  ;;  %v264_v24 = vld [vmem:[#allocation2 + $0x8] sm:$0xff] }
 0x1d8   :  { %v337_v19 = vpop.f32.mrf.mxu0  ;;  %164 = vst.msk [vmem:[#allocation2 + $0x10] sm:$0xff] %vm23_vm2, %v160_v17 }
 0x1d9   :  { %312 = vst.msk [vmem:[#allocation2] sm:$0xff] %vm23_vm2, %v308_v18 }
 0x1da   :  { %v190_v21 = vpop.f32.mrf.mxu2 }
 0x1db   :  { %v200_v23 = vadd.f32 %v190_v21, %v167_v20 }
 0x1dc   :  { %v316_v25 = vld [vmem:[#allocation2 + $0x20] sm:$0xff] }
 0x1dd   :  { %v155_v26 = vpop.f32.mrf.mxu1  ;;  %204 = vst.msk [vmem:[#allocation2 + $0x28] sm:$0xff] %vm23_vm2, %v200_v23  ;;  %v349_v27 = vadd.f32 %v337_v19, %v316_v25 }
 0x1de   :  { %v299_v28 = vpop.f32.mrf.mxu3  ;;  %v161_v29 = vadd.f32 %v155_v26, %v116_v22 }
 0x1df   :  { %v309_v30 = vadd.f32 %v299_v28, %v264_v24  ;;  %353 = vst.msk [vmem:[#allocation2 + $0x20] sm:$0xff] %vm23_vm2, %v349_v27  ;;  %v265_v35 = vld [vmem:[#allocation2 + $0x10] sm:$0xff] }
 0x1e0   :  { %v340_v31 = vpop.f32.mrf.mxu0  ;;  %165 = vst.msk [vmem:[#allocation2 + $0x18] sm:$0xff] %vm23_vm2, %v161_v29  ;;  %v357_v54 = vld [vmem:[#allocation2] sm:$0xff] }
 0x1e1   :  { %313 = vst.msk [vmem:[#allocation2 + $0x8] sm:$0xff] %vm23_vm2, %v309_v30  ;;  %v365_v61 = vsel %vm23_vm2, %v357_v54, -inf }
 0x1e2   :  { %v193_v33 = vpop.f32.mrf.mxu2 }
 0x1e3   :  { %v201_v34 = vadd.f32 %v193_v33, %v168_v32 }
 0x1e4   :  { %v317_v36 = vld [vmem:[#allocation2 + $0x28] sm:$0xff] }
 0x1e5   :  { %205 = vst.msk [vmem:[#allocation2 + $0x30] sm:$0xff] %vm23_vm2, %v201_v34  ;;  %v350_v37 = vadd.f32 %v340_v31, %v317_v36 }
 0x1e6   :  { %v302_v38 = vpop.f32.mrf.mxu3  ;;  %v361_v55 = vld [vmem:[#allocation2 + $0x20] sm:$0xff] }
 0x1e7   :  { %v310_v39 = vadd.f32 %v302_v38, %v265_v35  ;;  %354 = vst.msk [vmem:[#allocation2 + $0x28] sm:$0xff] %vm23_vm2, %v350_v37  ;;  %v266_v44 = vld [vmem:[#allocation2 + $0x18] sm:$0xff]  ;;  %v369_v0 = vsel %vm23_vm2, %v361_v55, -inf }
 0x1e8   :  { %v343_v41 = vpop.f32.mrf.mxu0  ;;  %v358_v52 = vld [vmem:[#allocation2 + $0x8] sm:$0xff]  ;;  %v370_v5 = vmax.f32 %v365_v61, %v369_v0 }
 0x1e9   :  { %314 = vst.msk [vmem:[#allocation2 + $0x10] sm:$0xff] %vm23_vm2, %v310_v39  ;;  %v366_v59 = vsel %vm23_vm2, %v358_v52, -inf }
 0x1ea   :  { %v196_v42 = vpop.f32.mrf.mxu2 }
 0x1eb   :  { %v202_v43 = vadd.f32 %v196_v42, %v169_v40 }
 0x1ec   :  { %v318_v45 = vld [vmem:[#allocation2 + $0x30] sm:$0xff] }
 0x1ed   :  { %206 = vst.msk [vmem:[#allocation2 + $0x38] sm:$0xff] %vm23_vm2, %v202_v43  ;;  %v351_v46 = vadd.f32 %v343_v41, %v318_v45 }
 0x1ee   :  { %v305_v47 = vpop.f32.mrf.mxu3  ;;  %v362_v53 = vld [vmem:[#allocation2 + $0x28] sm:$0xff] }
 0x1ef   :  { %v311_v48 = vadd.f32 %v305_v47, %v266_v44  ;;  %355 = vst.msk [vmem:[#allocation2 + $0x30] sm:$0xff] %vm23_vm2, %v351_v46  ;;  %v371_v60 = vsel %vm23_vm2, %v362_v53, -inf }
 0x1f0   :  { %v346_v49 = vpop.f32.mrf.mxu0  ;;  %v359_v56 = vld [vmem:[#allocation2 + $0x10] sm:$0xff]  ;;  %v372_v3 = vmax.f32 %v366_v59, %v371_v60 }
 0x1f1   :  { %315 = vst.msk [vmem:[#allocation2 + $0x18] sm:$0xff] %vm23_vm2, %v311_v48  ;;  %v367_v62 = vsel %vm23_vm2, %v359_v56, -inf }
 0x1f2   :  { %v377_v8 = vmax.f32 %v370_v5, %v372_v3 }
 0x1f4   :  { %v319_v50 = vld [vmem:[#allocation2 + $0x38] sm:$0xff] }
 0x1f5   :  { %v352_v51 = vadd.f32 %v346_v49, %v319_v50 }
 0x1f6   :  { %v363_v58 = vld [vmem:[#allocation2 + $0x30] sm:$0xff] }
 0x1f7   :  { %356 = vst.msk [vmem:[#allocation2 + $0x38] sm:$0xff] %vm23_vm2, %v352_v51  ;;  %v373_v1 = vsel %vm23_vm2, %v363_v58, -inf }
 0x1f8   :  { %v360_v57 = vld [vmem:[#allocation2 + $0x18] sm:$0xff]  ;;  %v374_v6 = vmax.f32 %v367_v62, %v373_v1 }
 0x1f9   :  { %v368_v63 = vsel %vm23_vm2, %v360_v57, -inf }
 0x1fe   :  { %v364_v2 = vld [vmem:[#allocation2 + $0x38] sm:$0xff] }
 0x1ff   :  { %v375_v4 = vsel %vm23_vm2, %v364_v2, -inf }
 0x200   :  { %v376_v7 = vmax.f32 %v368_v63, %v375_v4 }
 0x202   :  { %v378_v9 = vmax.f32 %v374_v6, %v376_v7 }
 0x204   :  { %v379_v10 = vmax.f32 %v377_v8, %v378_v9 }
 0x206   :  { %380 = vmax.xlane.f32.xlu1 %v379_v10 }
 0x279   :  { %v381_v11 = vpop.xlane.xlu1 %380 }
 0x27a   :  { %v382_v12 = vrot.slane %v381_v11, 4 }
 0x27c   :  { %v383_v13 = vmax.f32 %v381_v11, %v382_v12 }
 0x27e   :  { %v384_v14 = vrot.slane %v383_v13, 2 }
 0x280   :  { %v385_v15 = vmax.f32 %v383_v13, %v384_v14 }
 0x282   :  { %v386_v16 = vrot.slane %v385_v15, 1 }
 0x284   :  { %v387_v17 = vmax.f32 %v385_v15, %v386_v16 }
 0x286   :  { %440 = vpush %v387_v17 }
 0x2b7   :  { %s441_s2 = spop %440 }
 0x2b8   :  { %v389_v18 = vstv %s441_s2 }
 0x2b9   :  { %v390_v19 = vsub.f32 %v389_v18, %v357_v54  ;;  %v391_v20 = vsub.f32 %v389_v18, %v358_v52  ;;  %v392_v21 = vsub.f32 %v389_v18, %v359_v56  ;;  %v393_v22 = vsub.f32 %v389_v18, %v360_v57 }
 0x2ba   :  { %v394_v23 = vsub.f32 %v389_v18, %v361_v55  ;;  %v395_v24 = vsub.f32 %v389_v18, %v362_v53  ;;  %v396_v25 = vsub.f32 %v389_v18, %v363_v58  ;;  %v397_v26 = vsub.f32 %v389_v18, %v364_v2 }
 0x2bb   :  { %398 = vst.msk [vmem:[%s640_s6] sm:$0xff] %vm23_vm2, %v390_v19 }
 0x2bc   :  { %399 = vst.msk [vmem:[%s640_s6 + $0x8] sm:$0xff] %vm23_vm2, %v391_v20 }
 0x2bd   :  { %400 = vst.msk [vmem:[%s640_s6 + $0x10] sm:$0xff] %vm23_vm2, %v392_v21 }
 0x2be   :  { %401 = vst.msk [vmem:[%s640_s6 + $0x18] sm:$0xff] %vm23_vm2, %v393_v22 }
 0x2bf   :  { %402 = vst.msk [vmem:[%s640_s6 + $0x20] sm:$0xff] %vm23_vm2, %v394_v23 }
 0x2c0   :  { %403 = vst.msk [vmem:[%s640_s6 + $0x28] sm:$0xff] %vm23_vm2, %v395_v24 }
 0x2c1   :  { %404 = vst.msk [vmem:[%s640_s6 + $0x30] sm:$0xff] %vm23_vm2, %v396_v25 }
 0x2c2   :  { %405 = vst.msk [vmem:[%s640_s6 + $0x38] sm:$0xff] %vm23_vm2, %v397_v26 }

</bundles_post_ra>
